<compile_context>
chip_gen: v7x
topology: tpu7x:2x2x1
jax: 0.10.0
libtpu: 0.0.40
codegen_flags: <defaults>
</compile_context>

<pallas_src>
import functools
import math

import jax
import jax.numpy as jnp
from jax.experimental import pallas as pl
from jax.experimental.pallas import tpu as pltpu


_SLAB_LANES = 512              # fallback slab width: multiple of 128 -> unmasked vst
_MAX_BLOCK_LANES = 2048        # cap on a block's lane width in the fast path
_TARGET_BLOCK_BYTES = 8 << 20  # ~8 MiB blocks: per-step overhead becomes ~5% or less
_SPLIT_BYTES = 1 << 20         # above this, guarantee >= 2 grid blocks (v7x megacore)
_VMEM_LIMIT = 48 << 20         # 2 in-bufs + 2 out-bufs @ 8 MiB = 32 MiB + headroom,
                               # still under v7x's 64 MiB physical VMEM per TC


def _round_up(x, m):
    return ((x + m - 1) // m) * m


def _sublane_align(dtype):
    # sub-32-bit dtypes pack 2/4 rows per sublane -> align row counts accordingly
    return max(8, 32 // jnp.dtype(dtype).itemsize)


def _label_smoothing_kernel(x_ref, o_ref, *, scale, offset):
    # Elementwise y = (1 - eps) * x + eps / K, computed in f32 so the eps/K term
    # is not lost to bf16 ulp for large K; HBM traffic stays in the I/O dtype.
    xv = x_ref[...].astype(jnp.float32)
    o_ref[...] = (scale * xv + offset).astype(o_ref.dtype)


def _choose_tm(n_rows, lanes, itemsize, align):
    """Rows per block: ~_TARGET_BLOCK_BYTES, sublane-aligned, >=2 blocks if big."""
    tm_cap = (_TARGET_BLOCK_BYTES // (lanes * itemsize)) // align * align
    tm_cap = max(align, tm_cap)
    tm = min(tm_cap, _round_up(n_rows, align))
    # If one block would cover everything but the tensor is big enough to be worth
    # it, split so both v7x TensorCores get work (harmless pipelining on v5e/v6e).
    if tm >= n_rows and n_rows >= 2 * align and n_rows * lanes * itemsize >= _SPLIT_BYTES:
        tm = _round_up(pl.cdiv(n_rows, 2), align)
    return tm


def label_smoothing(x, epsilon=0.1):
    """Applies label smoothing to `x` along its last axis (Pallas TPU kernel)."""
    K = x.shape[-1]
    epsilon = float(epsilon)
    scale = 1.0 - epsilon
    offset = epsilon / float(K)   # computed in Python f64; rounded at store

    orig_shape = x.shape
    total = math.prod(orig_shape)
    itemsize = jnp.dtype(x.dtype).itemsize
    align = _sublane_align(x.dtype)
    kernel = functools.partial(_label_smoothing_kernel, scale=scale, offset=offset)

    if K % 128 == 0:
        # ---- fast path: natural last dim is lane-aligned -> zero extra copies ----
        R = total // K
        x2d = x.reshape(R, K)
        TN = min(K, _MAX_BLOCK_LANES)            # multiple of 128 since K is
        TM = _choose_tm(R, TN, itemsize, align)
        out2d = pl.pallas_call(
            kernel,
            out_shape=jax.ShapeDtypeStruct((R, K), x.dtype),
            grid=(pl.cdiv(R, TM), pl.cdiv(K, TN)),   # partial blocks are masked
            in_specs=[pl.BlockSpec((TM, TN), lambda i, j: (i, j))],
            out_specs=pl.BlockSpec((TM, TN), lambda i, j: (i, j)),
            compiler_params=pltpu.CompilerParams(
                dimension_semantics=("parallel", "parallel"),
                vmem_limit_bytes=_VMEM_LIMIT,
            ),
        )(x2d)
        return out2d.reshape(orig_shape)

    # ---- fallback: lane-dense slab [M, 512]; pad only the sub-512-element tail ----
    M = pl.cdiv(total, _SLAB_LANES)
    padded_total = M * _SLAB_LANES
    flat = x.reshape(-1)
    if padded_total != total:
        # Tail pad is < 512 elements (< 2 KiB f32); padded values are computed but
        # never read back inside the valid range.
        flat = jnp.pad(flat, (0, padded_total - total))
    x2d = flat.reshape(M, _SLAB_LANES)

    TM = _choose_tm(M, _SLAB_LANES, itemsize, align)
    out2d = pl.pallas_call(
        kernel,
        out_shape=jax.ShapeDtypeStruct((M, _SLAB_LANES), x.dtype),
        grid=(pl.cdiv(M, TM),),                      # partial final block is masked
        in_specs=[pl.BlockSpec((TM, _SLAB_LANES), lambda i: (i, 0))],
        out_specs=pl.BlockSpec((TM, _SLAB_LANES), lambda i: (i, 0)),
        compiler_params=pltpu.CompilerParams(
            dimension_semantics=("parallel",),
            vmem_limit_bytes=_VMEM_LIMIT,
        ),
    )(x2d)

    out_flat = out2d.reshape(-1)
    if padded_total != total:
        out_flat = out_flat[:total]
    return out_flat.reshape(orig_shape)


if __name__ == "__main__":
    eps = 0.1

    # (batch=2, seq=8, vocab=32) — typical input; exercises the slab path, no pad.
    x = jax.random.uniform(jax.random.PRNGKey(0), (2, 8, 32), dtype=jnp.float32)
    out = jax.block_until_ready(label_smoothing(x, epsilon=eps))
    ref = (1.0 - eps) * x + eps / x.shape[-1]
    assert out.shape == x.shape
    assert jnp.allclose(out, ref, atol=1e-6), "mismatch vs reference (small case)"

    # K % 128 == 0 — exercises the zero-copy fast path (2-D grid).
    xf = jax.random.normal(jax.random.PRNGKey(1), (2, 8, 128), dtype=jnp.float32)
    outf = jax.block_until_ready(label_smoothing(xf, epsilon=eps))
    reff = (1.0 - eps) * xf + eps / xf.shape[-1]
    assert outf.shape == xf.shape
    assert jnp.allclose(outf, reff, atol=1e-6), "mismatch vs reference (fast path)"

    # Awkward shape — exercises the slab path with a tiny tail pad + masked block.
    x2 = jax.random.normal(jax.random.PRNGKey(2), (4, 200, 300), dtype=jnp.float32)
    out2 = jax.block_until_ready(label_smoothing(x2, epsilon=eps))
    ref2 = (1.0 - eps) * x2 + eps / x2.shape[-1]
    assert out2.shape == x2.shape
    assert jnp.allclose(out2, ref2, atol=1e-6), "mismatch vs reference (padded case)"

    # bf16 with large K — checks that the eps/K term survives (f32 internal compute).
    xb = jax.random.normal(jax.random.PRNGKey(3), (2, 8, 4096), dtype=jnp.bfloat16)
    outb = jax.block_until_ready(label_smoothing(xb, epsilon=eps))
    refb = ((1.0 - eps) * xb.astype(jnp.float32)
            + eps / xb.shape[-1]).astype(jnp.bfloat16)
    assert outb.shape == xb.shape
    assert jnp.allclose(outb.astype(jnp.float32), refb.astype(jnp.float32),
                        atol=1e-2), "mismatch vs reference (bf16 case)"

    print("KERNEL_OK")
</pallas_src>

<mosaic_0001>
module attributes {stable_mosaic.version = 11 : i64} {
  func.func @_label_smoothing_kernel(%arg0: i32, %arg1: memref<8x512xf32, #tpu.memory_space<vmem>>, %arg2: memref<8x512xf32, #tpu.memory_space<vmem>>) attributes {dimension_semantics = [#tpu.dimension_semantics<parallel>], iteration_bounds = array<i64: 1>, scalar_prefetch = 0 : i64, scratch_operands = 0 : i64, tpu.core_type = #tpu.core_type<tc>, window_params = [{transform_indices = @transform_0, window_bounds = array<i64: 8, 512>}, {transform_indices = @transform_1, window_bounds = array<i64: 8, 512>}]} {
    %c0 = arith.constant 0 : index
    %c0_0 = arith.constant 0 : index
    %0 = vector.load %arg1[%c0, %c0_0] : memref<8x512xf32, #tpu.memory_space<vmem>>, vector<8x512xf32>
    %cst = arith.constant 0.899999976 : f32
    %1 = vector.broadcast %cst : f32 to vector<8x512xf32>
    %2 = arith.mulf %1, %0 : vector<8x512xf32>
    %cst_1 = arith.constant 3.125000e-03 : f32
    %3 = vector.broadcast %cst_1 : f32 to vector<8x512xf32>
    %4 = arith.addf %2, %3 : vector<8x512xf32>
    %c0_2 = arith.constant 0 : index
    %c0_3 = arith.constant 0 : index
    %5 = vector.load %arg2[%c0_2, %c0_3] : memref<8x512xf32, #tpu.memory_space<vmem>>, vector<8x512xf32>
    tpu.vector_store %arg2[%c0_2, %c0_3], %4 {strides = array<i32>} : memref<8x512xf32, #tpu.memory_space<vmem>>, vector<8x512xf32>,
    return
  }
  func.func @transform_0(%arg0: i32) -> (i32, i32) {
    %c0_i32 = arith.constant 0 : i32
    %c0_i32_0 = arith.constant 0 : i32
    return %arg0, %c0_i32 : i32, i32
  }
  func.func @transform_1(%arg0: i32) -> (i32, i32) {
    %c0_i32 = arith.constant 0 : i32
    %c0_i32_0 = arith.constant 0 : i32
    return %arg0, %c0_i32 : i32, i32
  }
}

</mosaic_0001>

<bundles_post_ra>
// kernel: tpu_custom_call.1
= control target key start
LH: loop header
LB: loop body
LE: loop exit
PB: predicated region body
PF: predicated region fallthrough
CT: control target
= control target key end

     0   :  { %6 = vsyncpa [#allocation3], 0  ;;  %s192_s0 = inlined_call_operand.hbm [shape: f32[1,512], index: 0, kind: input, shape index: {}]   ;;  %s193_s1 = inlined_call_operand.hbm [shape: f32[1,512], index: 1, kind: output, shape index: {}]  }
   0x1   :  { %7 = vsyncpa [#allocation4], 0 }
   0x2   :  { %12 = vsyncadd [#allocation3], 448  ;;  %s128_s6 = smov [#allocation2]   ;;  %s80_s10 = scalar_lea.hbm %s192_s0, 64 }
   0x3   :  { %s13_s7 = sshll.u32 %s128_s6, 4  ;;  %p81_p0 = scmp.ne.s32.totalorder %s192_s0, %s80_s10  ;;  %s14_s7 = int_to_ptr.vmem [resolvable:$true] %s13_s7 }
   0x4   :  { %p84_p1 = scmp.lt.u32.totalorder %s80_s10, %s192_s0 }
   0x6   :  { %p86_p2 = pnand %p84_p1, %p81_p0 }
   0x8   :  { %89 = shalt.err (!%p86_p2)
}
   0x9   :  { %s90_s15 = scalar_lea.vmem %s14_s7, 64  ;;  %s94_s16 = scalar_lea.vmem %s14_s7, 512 }
   0xa   :  { %p91_p3 = scmp.ne.s32.totalorder %s14_s7, %s90_s15  ;;  %p95_p4 = scmp.lt.s32.totalorder %s14_s7, %s14_s7 }
   0xb   :  { %p96_p5 = scmp.lt.s32.totalorder %s94_s16, %s90_s15 }
   0xd   :  { %p97_p6 = por %p96_p5, %p95_p4 }
   0xf   :  { %p98_p7 = pnand %p97_p6, %p91_p3 }
  0x11   :  { %101 = shalt.err (!%p98_p7)
}
  0x12   :  { %s129_s17 = smov 64   ;;  %s130_s18 = smov 4  }
  0x13   :  { %19 = dma.hbm_to_vmem [thread:$0]  %s192_s0, 64, %s14_s7, [#allocation3], %s129_s17, %s129_s17, %s130_s18  }
  0x14   :  { %124 = dma.done.wait [#allocation3], 512  }
  0x15   :  { %125 = vsyncadd [#allocation3], 4294966784  ;;  %v47_v0 = vlaneseq  ;;  %v23_v2 = vld [vmem:[#allocation2] sm:$0xf]  ;;  %v24_v3 = vld [vmem:[#allocation2 + $0x4] sm:$0xf] }
  0x16   :  { %v25_v4 = vld [vmem:[#allocation2 + $0x8] sm:$0xf]  ;;  %v31_v5 = vmul.f32 0.9, %v23_v2  ;;  %v32_v6 = vmul.f32 0.9, %v24_v3 }
  0x17   :  { %vm157_vm0 = vcmp.lt.s32.totalorder %v47_v0, 512  ;;  %v33_v7 = vmul.f32 0.9, %v25_v4  ;;  %v26_v8 = vld [vmem:[#allocation2 + $0xc] sm:$0xf] }
  0x18   :  { %v27_v9 = vld [vmem:[#allocation2 + $0x10] sm:$0xf]  ;;  %v28_v10 = vld [vmem:[#allocation2 + $0x14] sm:$0xf]  ;;  %v39_v11 = vadd.f32 0.003125, %v31_v5 }
  0x19   :  { %v40_v12 = vadd.f32 0.003125, %v32_v6  ;;  %v41_v13 = vadd.f32 0.003125, %v33_v7  ;;  %v34_v14 = vmul.f32 0.9, %v26_v8 }
  0x1a   :  { %v35_v15 = vmul.f32 0.9, %v27_v9  ;;  %v36_v16 = vmul.f32 0.9, %v28_v10  ;;  %51 = vst.msk [vmem:[#allocation5] sm:$0xf] %vm157_vm0, %v39_v11 }
  0x1b   :  { %52 = vst.msk [vmem:[#allocation5 + $0x4] sm:$0xf] %vm157_vm0, %v40_v12  ;;  %53 = vst.msk [vmem:[#allocation5 + $0x8] sm:$0xf] %vm157_vm0, %v41_v13  ;;  %v29_v17 = vld [vmem:[#allocation2 + $0x18] sm:$0xf] }
  0x1c   :  { %v30_v18 = vld [vmem:[#allocation2 + $0x1c] sm:$0xf]  ;;  %v42_v19 = vadd.f32 0.003125, %v34_v14  ;;  %v43_v20 = vadd.f32 0.003125, %v35_v15 }
  0x1d   :  { %v44_v21 = vadd.f32 0.003125, %v36_v16  ;;  %v37_v22 = vmul.f32 0.9, %v29_v17  ;;  %v38_v23 = vmul.f32 0.9, %v30_v18 }
  0x1e   :  { %54 = vst.msk [vmem:[#allocation5 + $0xc] sm:$0xf] %vm157_vm0, %v42_v19  ;;  %55 = vst.msk [vmem:[#allocation5 + $0x10] sm:$0xf] %vm157_vm0, %v43_v20 }
  0x1f   :  { %56 = vst.msk [vmem:[#allocation5 + $0x14] sm:$0xf] %vm157_vm0, %v44_v21  ;;  %v45_v24 = vadd.f32 0.003125, %v37_v22  ;;  %v46_v25 = vadd.f32 0.003125, %v38_v23 }
  0x21   :  { %57 = vst.msk [vmem:[#allocation5 + $0x18] sm:$0xf] %vm157_vm0, %v45_v24  ;;  %58 = vst.msk [vmem:[#allocation5 + $0x1c] sm:$0xf] %vm157_vm0, %v46_v25 }
  0x22   :  { %63 = vsyncadd [#allocation4], 448  ;;  %s131_s0 = smov [#allocation5]  }
  0x23   :  { %s64_s21 = sshll.u32 %s131_s0, 4  ;;  %s65_s21 = int_to_ptr.vmem [resolvable:$true] %s64_s21 }
  0x24   :  { %s102_s22 = scalar_lea.vmem %s65_s21, 64  ;;  %s106_s23 = scalar_lea.vmem %s65_s21, 512 }
  0x25   :  { %p103_p8 = scmp.ne.s32.totalorder %s65_s21, %s102_s22  ;;  %p107_p9 = scmp.lt.s32.totalorder %s65_s21, %s65_s21 }
  0x26   :  { %p108_p10 = scmp.lt.s32.totalorder %s106_s23, %s102_s22 }
  0x28   :  { %p109_p11 = por %p108_p10, %p107_p9 }
  0x2a   :  { %p110_p12 = pnand %p109_p11, %p103_p8 }
  0x2c   :  { %113 = shalt.err (!%p110_p12)
}
  0x2d   :  { %s114_s26 = scalar_lea.hbm %s193_s1, 64 }
  0x2e   :  { %p115_p13 = scmp.ne.s32.totalorder %s193_s1, %s114_s26  ;;  %p118_p0 = scmp.lt.u32.totalorder %s114_s26, %s193_s1 }
  0x30   :  { %p120_p1 = pnand %p118_p0, %p115_p13 }
  0x32   :  { %123 = shalt.err (!%p120_p1)
}
  0x33   :  { %70 = dma.vmem_to_hbm [thread:$0]  %s65_s21, 64, %s193_s1, [#allocation4], %s129_s17, %s129_s17, %s130_s18  }
  0x34   :  { %126 = dma.done.wait [#allocation4], 512  }
  0x35   :  { %127 = vsyncadd [#allocation4], 4294966784 }
  0x36   :  { %74 = vsyncpa [#allocation3], 1 }
  0x37   :  { %75 = vsyncpa [#allocation4], 1 }

</bundles_post_ra>
